<compile_context>
chip_gen: v6e
topology: v6e:2x2x1
jax: 0.10.0
libtpu: 0.0.40
codegen_flags: <defaults>
</compile_context>

<pallas_src>
import jax
import jax.numpy as jnp
from jax.experimental import pallas as pl
from jax.experimental.pallas import tpu as pltpu

IN_FEATURES = 28 * 28     # 784
HIDDEN = 128
OUT_FEATURES = 10


def _round_up(x, m):
    return ((x + m - 1) // m) * m


def _mlp_kernel(x_ref, w1_ref, b1_ref, w2_ref, b2_ref, o_ref):
    # x arrives as the raw f32 rows straight from HBM; cast to bf16 in VMEM so
    # both matmuls run at full bf16 MXU rate with f32 accumulation.
    x = x_ref[...].astype(jnp.bfloat16)                       # (TB, 784)
    h = jnp.dot(x, w1_ref[...], preferred_element_type=jnp.float32)
    h = jnp.maximum(h + b1_ref[...], 0.0)                     # f32 bias + ReLU
    out = jnp.dot(h.astype(jnp.bfloat16), w2_ref[...],
                  preferred_element_type=jnp.float32)         # (TB, 10) f32
    o_ref[...] = (out + b2_ref[...]).astype(o_ref.dtype)


def mlp_forward(x_nchw, w1, b1, w2, b2):
    """Forward pass of Net.

    x_nchw: (B, 1, 28, 28) float32 (NCHW, like the PyTorch module)
    w1: (784, 128), b1: (128,), w2: (128, 10), b2: (10,)
    returns: (B, 10) float32 logits
    """
    B = x_nchw.shape[0]
    x = x_nchw.reshape(B, IN_FEATURES)        # matches x.view(-1, 28*28)

    # Big batch tile for large B (amortize per-step pipeline overhead, bigger
    # DMAs); otherwise just round up to a multiple of 8 sublanes.  No batch
    # padding of the array: the grid is cdiv(B, TB) and Pallas masks the
    # ragged last block's writes.
    TB = 1024 if B >= 1024 else _round_up(B, 8)
    grid = (pl.cdiv(B, TB),)

    # Resident operands: weights in bf16 (half the DMA bytes, full MXU rate),
    # biases in f32 as (1, N) rows.  These casts are tiny one-time ops.
    w1_b = w1.astype(jnp.bfloat16)                               # (784, 128)
    w2_b = w2.astype(jnp.bfloat16)                               # (128, 10)
    b1_2d = b1.reshape(1, HIDDEN).astype(jnp.float32)            # (1, 128)
    b2_2d = b2.reshape(1, OUT_FEATURES).astype(jnp.float32)      # (1, 10)

    cost = pl.CostEstimate(
        flops=2 * B * (IN_FEATURES * HIDDEN + HIDDEN * OUT_FEATURES),
        transcendentals=0,
        bytes_accessed=(x.size * 4 + w1_b.size * 2 + w2_b.size * 2
                        + b1_2d.size * 4 + b2_2d.size * 4
                        + B * OUT_FEATURES * 4),
    )

    return pl.pallas_call(
        _mlp_kernel,
        out_shape=jax.ShapeDtypeStruct((B, OUT_FEATURES), jnp.float32),
        grid=grid,
        in_specs=[
            pl.BlockSpec((TB, IN_FEATURES), lambda i: (i, 0)),       # x tile (pipelined)
            pl.BlockSpec((IN_FEATURES, HIDDEN), lambda i: (0, 0)),   # W1 (resident)
            pl.BlockSpec((1, HIDDEN), lambda i: (0, 0)),             # b1 (resident)
            pl.BlockSpec((HIDDEN, OUT_FEATURES), lambda i: (0, 0)),  # W2 (resident)
            pl.BlockSpec((1, OUT_FEATURES), lambda i: (0, 0)),       # b2 (resident)
        ],
        out_specs=pl.BlockSpec((TB, OUT_FEATURES), lambda i: (i, 0)),
        compiler_params=pltpu.CompilerParams(
            dimension_semantics=("parallel",),   # batch axis shards across TCs (v7x)
            vmem_limit_bytes=32 << 20,
        ),
        cost_estimate=cost,
    )(x, w1_b, b1_2d, w2_b, b2_2d)


def init_params(key):
    """Deterministic init mimicking PyTorch nn.Linear default (U[-1/sqrt(fan_in), +])."""
    k1, k2, k3, k4 = jax.random.split(key, 4)
    bound1 = 1.0 / jnp.sqrt(784.0)
    bound2 = 1.0 / jnp.sqrt(128.0)
    w1 = jax.random.uniform(k1, (IN_FEATURES, HIDDEN), jnp.float32, -bound1, bound1)
    b1 = jax.random.uniform(k2, (HIDDEN,), jnp.float32, -bound1, bound1)
    w2 = jax.random.uniform(k3, (HIDDEN, OUT_FEATURES), jnp.float32, -bound2, bound2)
    b2 = jax.random.uniform(k4, (OUT_FEATURES,), jnp.float32, -bound2, bound2)
    return w1, b1, w2, b2


if __name__ == "__main__":
    key = jax.random.PRNGKey(0)
    k_x, k_p = jax.random.split(key)
    B = 8
    x = jax.random.normal(k_x, (B, 1, 28, 28), dtype=jnp.float32)
    w1, b1, w2, b2 = init_params(k_p)

    out = mlp_forward(x, w1, b1, w2, b2)
    out = jax.block_until_ready(out)
    assert out.shape == (B, 10)

    # Reference with the same bf16 operand rounding (f32 accumulation) so the
    # comparison is tight.
    x_flat = x.reshape(B, IN_FEATURES)
    xb = x_flat.astype(jnp.bfloat16).astype(jnp.float32)
    w1b = w1.astype(jnp.bfloat16).astype(jnp.float32)
    w2b = w2.astype(jnp.bfloat16).astype(jnp.float32)
    h_ref = jnp.maximum(xb @ w1b + b1, 0.0)
    ref = h_ref.astype(jnp.bfloat16).astype(jnp.float32) @ w2b + b2
    assert jnp.allclose(out, ref, atol=2e-2, rtol=2e-2)

    # Loose sanity check against pure-f32 math (bf16 rounding tolerance).
    ref_f32 = jnp.maximum(x_flat @ w1 + b1, 0.0) @ w2 + b2
    assert jnp.allclose(out, ref_f32, atol=5e-2, rtol=5e-2)

    print("KERNEL_OK")
</pallas_src>

<mosaic_0001>
module attributes {stable_mosaic.version = 11 : i64} {
  func.func @_mlp_kernel(%arg0: i32, %arg1: memref<8x784xf32, #tpu.memory_space<vmem>>, %arg2: memref<784x128xbf16, #tpu.memory_space<vmem>>, %arg3: memref<1x128xf32, #tpu.memory_space<vmem>>, %arg4: memref<128x10xbf16, #tpu.memory_space<vmem>>, %arg5: memref<1x10xf32, #tpu.memory_space<vmem>>, %arg6: memref<8x10xf32, #tpu.memory_space<vmem>>) attributes {dimension_semantics = [#tpu.dimension_semantics<parallel>], iteration_bounds = array<i64: 1>, scalar_prefetch = 0 : i64, scratch_operands = 0 : i64, tpu.core_type = #tpu.core_type<tc>, window_params = [{transform_indices = @transform_0, window_bounds = array<i64: 8, 784>}, {pipeline_mode = #tpu.pipeline_mode<synchronous>, transform_indices = @transform_1, window_bounds = array<i64: 784, 128>}, {pipeline_mode = #tpu.pipeline_mode<synchronous>, transform_indices = @transform_2, window_bounds = array<i64: 1, 128>}, {pipeline_mode = #tpu.pipeline_mode<synchronous>, transform_indices = @transform_3, window_bounds = array<i64: 128, 10>}, {pipeline_mode = #tpu.pipeline_mode<synchronous>, transform_indices = @transform_4, window_bounds = array<i64: 1, 10>}, {transform_indices = @transform_5, window_bounds = array<i64: 8, 10>}]} {
    %c0 = arith.constant 0 : index
    %c0_0 = arith.constant 0 : index
    %0 = vector.load %arg1[%c0, %c0_0] : memref<8x784xf32, #tpu.memory_space<vmem>>, vector<8x784xf32>
    %1 = arith.truncf %0 : vector<8x784xf32> to vector<8x784xbf16>
    %c0_1 = arith.constant 0 : index
    %c0_2 = arith.constant 0 : index
    %2 = vector.load %arg2[%c0_1, %c0_2] : memref<784x128xbf16, #tpu.memory_space<vmem>>, vector<784x128xbf16>
    %cst = arith.constant dense<0.000000e+00> : vector<8x128xf32>
    %3 = tpu.matmul %1, %2, %cst {dimension_numbers = #tpu.dot_dimension_numbers<[1], [0], [0], [1], [0, 0, 1, 1], [], []>} : vector<8x784xbf16>, vector<784x128xbf16>, vector<8x128xf32> -> vector<8x128xf32>
    %c0_3 = arith.constant 0 : index
    %c0_4 = arith.constant 0 : index
    %4 = vector.load %arg3[%c0_3, %c0_4] : memref<1x128xf32, #tpu.memory_space<vmem>>, vector<1x128xf32>
    %5 = vector.broadcast %4 : vector<1x128xf32> to vector<8x128xf32>
    %6 = arith.addf %3, %5 : vector<8x128xf32>
    %cst_5 = arith.constant 0.000000e+00 : f32
    %7 = vector.broadcast %cst_5 : f32 to vector<8x128xf32>
    %8 = arith.maximumf %6, %7 : vector<8x128xf32>
    %9 = arith.truncf %8 : vector<8x128xf32> to vector<8x128xbf16>
    %c0_6 = arith.constant 0 : index
    %c0_7 = arith.constant 0 : index
    %10 = vector.load %arg4[%c0_6, %c0_7] : memref<128x10xbf16, #tpu.memory_space<vmem>>, vector<128x10xbf16>
    %cst_8 = arith.constant dense<0.000000e+00> : vector<8x10xf32>
    %11 = tpu.matmul %9, %10, %cst_8 {dimension_numbers = #tpu.dot_dimension_numbers<[1], [0], [0], [1], [0, 0, 1, 1], [], []>} : vector<8x128xbf16>, vector<128x10xbf16>, vector<8x10xf32> -> vector<8x10xf32>
    %c0_9 = arith.constant 0 : index
    %c0_10 = arith.constant 0 : index
    %12 = vector.load %arg5[%c0_9, %c0_10] : memref<1x10xf32, #tpu.memory_space<vmem>>, vector<1x10xf32>
    %13 = vector.broadcast %12 : vector<1x10xf32> to vector<8x10xf32>
    %14 = arith.addf %11, %13 : vector<8x10xf32>
    %c0_11 = arith.constant 0 : index
    %c0_12 = arith.constant 0 : index
    %15 = vector.load %arg6[%c0_11, %c0_12] : memref<8x10xf32, #tpu.memory_space<vmem>>, vector<8x10xf32>
    tpu.vector_store %arg6[%c0_11, %c0_12], %14 {strides = array<i32>} : memref<8x10xf32, #tpu.memory_space<vmem>>, vector<8x10xf32>,
    return
  }
  func.func @transform_0(%arg0: i32) -> (i32, i32) {
    %c0_i32 = arith.constant 0 : i32
    %c0_i32_0 = arith.constant 0 : i32
    return %arg0, %c0_i32 : i32, i32
  }
  func.func @transform_1(%arg0: i32) -> (i32, i32) {
    %c0_i32 = arith.constant 0 : i32
    %c0_i32_0 = arith.constant 0 : i32
    %c0_i32_1 = arith.constant 0 : i32
    return %c0_i32, %c0_i32_0 : i32, i32
  }
  func.func @transform_2(%arg0: i32) -> (i32, i32) {
    %c0_i32 = arith.constant 0 : i32
    %c0_i32_0 = arith.constant 0 : i32
    %c0_i32_1 = arith.constant 0 : i32
    return %c0_i32, %c0_i32_0 : i32, i32
  }
  func.func @transform_3(%arg0: i32) -> (i32, i32) {
    %c0_i32 = arith.constant 0 : i32
    %c0_i32_0 = arith.constant 0 : i32
    %c0_i32_1 = arith.constant 0 : i32
    return %c0_i32, %c0_i32_0 : i32, i32
  }
  func.func @transform_4(%arg0: i32) -> (i32, i32) {
    %c0_i32 = arith.constant 0 : i32
    %c0_i32_0 = arith.constant 0 : i32
    %c0_i32_1 = arith.constant 0 : i32
    return %c0_i32, %c0_i32_0 : i32, i32
  }
  func.func @transform_5(%arg0: i32) -> (i32, i32) {
    %c0_i32 = arith.constant 0 : i32
    %c0_i32_0 = arith.constant 0 : i32
    return %arg0, %c0_i32 : i32, i32
  }
}

</mosaic_0001>

<bundles_post_ra>
// kernel: tpu_custom_call.1
= control target key start
LH: loop header
LB: loop body
LE: loop exit
PB: predicated region body
PF: predicated region fallthrough
CT: control target
= control target key end

     0   :  { %10 = vsyncpa [#allocation3], 0  ;;  %s1119_s0 = inlined_call_operand.vmem [shape: f32[8,784], index: 0, kind: input, shape index: {}]   ;;  %s1120_s1 = inlined_call_operand.hbm [shape: bf16[784,128], index: 1, kind: input, shape index: {}]   ;;  %s1121_s2 = inlined_call_operand.vmem [shape: f32[1,128], index: 2, kind: input, shape index: {}]   ;;  %s1122_s3 = inlined_call_operand.vmem [shape: bf16[128,10], index: 3, kind: input, shape index: {}]   ;;  %s1123_s4 = inlined_call_operand.vmem [shape: f32[1,10], index: 4, kind: input, shape index: {}]   ;;  %s1124_s5 = inlined_call_operand.hbm [shape: f32[8,10], index: 5, kind: output, shape index: {}]  }
   0x1   :  { %11 = vsyncpa [#allocation4], 0  ;;  %s1013_s18 = smov [#allocation2]  }
   0x2   :  { %s19_s19 = sshll.u32 %s1013_s18, 4  ;;  %s20_s19 = int_to_ptr.vmem [resolvable:$true] %s19_s19 }
   0x3   :  { %s977_s20 = scalar_lea.vmem %s20_s19, 6272  ;;  %p982_p1 = scmp.lt.s32.totalorder %s20_s19, %s20_s19 }
   0x4   :  { %p978_p0 = scmp.ne.s32.totalorder %s20_s19, %s977_s20  ;;  %p983_p2 = scmp.lt.s32.totalorder %s977_s20, %s977_s20 }
   0x6   :  { %p984_p3 = por %p983_p2, %p982_p1 }
   0x8   :  { %p985_p4 = pnand %p984_p3, %p978_p0 }
   0xa   :  { %988 = shalt.err (!%p985_p4)
}
   0xb   :  { %s1014_s21 = smov 64   ;;  %s1015_s22 = smov 4  }
   0xc   :  { %25 = dma.hbm_to_vmem [thread:$0]  %s1120_s1, 6272, %s20_s19, [#allocation3], %s1014_s21, %s1014_s21, %s1015_s22  }
   0xd   :  { %1009 = dma.done.wait [#allocation3], 6272  }
   0xe   :  { %1010 = vsyncadd [#allocation3], 4294961024  ;;  %v912_v0 = vld [vmem:[#allocation2 + $0x78] sm:$0xff]   ;;  %v916_v4 = vld [vmem:[#allocation2 + $0x70] sm:$0xff]   ;;  %v1016_v44 = vmov 0.0   ;;  %vm1017_vm0 = vmmov 0  }
   0xf   :  { %v913_v1 = vld [vmem:[#allocation2 + $0x38] sm:$0xff]   ;;  %803 = vmatprep.subr.bf16.mxu0 %v912_v0  ;;  %v917_v5 = vld [vmem:[#allocation2 + $0x30] sm:$0xff]   ;;  %v920_v8 = vld [vmem:[#allocation2 + $0x68] sm:$0xff]   ;;  %vm449_vm1 = vcmask 130048   ;;  %s1018_s30 = smov [#allocation5]   ;;  %vm726_vm2 = vcmask 80896  }
  0x10   :  { %v914_v2 = vld [vmem:[#allocation2 + $0xf8] sm:$0xff]   ;;  %804 = vmatpush3.bf16.msra.mxu0 %v913_v1  ;;  %v918_v6 = vld [vmem:[#allocation2 + $0xf0] sm:$0xff]   ;;  %v921_v9 = vld [vmem:[#allocation2 + $0x28] sm:$0xff]   ;;  %s734_s6 = sshll.u32 %s1018_s30, 4  ;;  %s735_s6 = int_to_ptr.vmem [resolvable:$true] %s734_s6 }
  0x11   :  { %v915_v3 = vld [vmem:[#allocation2 + $0xb8] sm:$0xff]   ;;  %825 = vmatprep.subr.bf16.mxu1 %v914_v2  ;;  %805 = vmatprep.subr.bf16.mxu0 %v916_v4  ;;  %v919_v7 = vld [vmem:[#allocation2 + $0xb0] sm:$0xff]   ;;  %v922_v10 = vld [vmem:[#allocation2 + $0xe8] sm:$0xff]   ;;  %p994_p6 = scmp.lt.s32.totalorder %s735_s6, %s735_s6 }
  0x12   :  { %826 = vmatpush3.bf16.msra.mxu1 %v915_v3  ;;  %v923_v11 = vld [vmem:[#allocation2 + $0xa8] sm:$0xff]   ;;  %v924_v12 = vld [vmem:[#allocation2 + $0x60] sm:$0xff]   ;;  %v928_v16 = vld [vmem:[#allocation2 + $0x58] sm:$0xff]  }
  0x13   :  { %827 = vmatprep.subr.bf16.mxu1 %v918_v6  ;;  %v925_v13 = vld [vmem:[#allocation2 + $0x20] sm:$0xff]   ;;  %v929_v17 = vld [vmem:[#allocation2 + $0x18] sm:$0xff]   ;;  %v932_v20 = vld [vmem:[#allocation2 + $0x50] sm:$0xff]  }
  0x14   :  { %806 = vmatpush3.bf16.msra.mxu0 %v917_v5  ;;  %v926_v14 = vld [vmem:[#allocation2 + $0xe0] sm:$0xff]   ;;  %v930_v18 = vld [vmem:[#allocation2 + $0xd8] sm:$0xff]   ;;  %v933_v21 = vld [vmem:[#allocation2 + $0x10] sm:$0xff]  }
  0x15   :  { %807 = vmatprep.subr.bf16.mxu0 %v920_v8  ;;  %v927_v15 = vld [vmem:[#allocation2 + $0xa0] sm:$0xff]   ;;  %v931_v19 = vld [vmem:[#allocation2 + $0x98] sm:$0xff]   ;;  %v934_v22 = vld [vmem:[#allocation2 + $0xd0] sm:$0xff]  }
  0x16   :  { %828 = vmatpush3.bf16.msra.mxu1 %v919_v7  ;;  %v935_v23 = vld [vmem:[#allocation2 + $0x90] sm:$0xff]   ;;  %v936_v24 = vld [vmem:[#allocation2 + $0x48] sm:$0xff]   ;;  %v940_v28 = vld [vmem:[#allocation2 + $0x40] sm:$0xff]  }
  0x17   :  { %829 = vmatprep.subr.bf16.mxu1 %v922_v10  ;;  %v937_v25 = vld [vmem:[#allocation2 + $0x8] sm:$0xff]   ;;  %v941_v29 = vld [vmem:[#allocation2] sm:$0xff]   ;;  %v944_v36 = vld [vmem:[#allocation2 + $0x178] sm:$0xff]  }
  0x18   :  { %808 = vmatpush3.bf16.msra.mxu0 %v921_v9  ;;  %v938_v26 = vld [vmem:[#allocation2 + $0xc8] sm:$0xff]   ;;  %v942_v30 = vld [vmem:[#allocation2 + $0xc0] sm:$0xff]   ;;  %v39_v37 = vld [vmem:[%s1119_s0 + $0x18] sm:$0xff] }
  0x19   :  { %809 = vmatprep.subr.bf16.mxu0 %v924_v12  ;;  %v939_v27 = vld [vmem:[#allocation2 + $0x88] sm:$0xff]   ;;  %v943_v33 = vld [vmem:[#allocation2 + $0x80] sm:$0xff]   ;;  %v46_v38 = vpack.c.bf16 %v39_v37, %v39_v37  ;;  %v945_v39 = vld [vmem:[#allocation2 + $0x138] sm:$0xff]  }
  0x1a   :  { %830 = vmatpush3.bf16.msra.mxu1 %v923_v11  ;;  %v37_v31 = vld [vmem:[%s1119_s0 + $0x8] sm:$0xff]  ;;  %v36_v34 = vld [vmem:[%s1119_s0] sm:$0xff]  ;;  %v38_v40 = vld [vmem:[%s1119_s0 + $0x10] sm:$0xff] }
  0x1b   :  { %831 = vmatprep.subr.bf16.mxu1 %v926_v14  ;;  %v44_v32 = vpack.c.bf16 %v37_v31, %v37_v31  ;;  %v43_v35 = vpack.c.bf16 %v36_v34, %v36_v34  ;;  %525 = vmatprep.mubr.bf16.mxu1 %v46_v38  ;;  %v45_v41 = vpack.c.bf16 %v38_v40, %v38_v40  ;;  %v946_v42 = vld [vmem:[#allocation2 + $0x170] sm:$0xff]   ;;  %v948_v45 = vld [vmem:[#allocation2 + $0x168] sm:$0xff]   ;;  %v950_v47 = vld [vmem:[#allocation2 + $0x160] sm:$0xff]  }
  0x1c   :  { %810 = vmatpush3.bf16.msra.mxu0 %v925_v13  ;;  %v947_v43 = vld [vmem:[#allocation2 + $0x130] sm:$0xff]   ;;  %v949_v46 = vld [vmem:[#allocation2 + $0x128] sm:$0xff]   ;;  %v951_v48 = vld [vmem:[#allocation2 + $0x120] sm:$0xff]  }
  0x1d   :  { %811 = vmatprep.subr.bf16.mxu0 %v928_v16  ;;  %485 = vmatprep.mubr.bf16.mxu0 %v44_v32  ;;  %v952_v49 = vld [vmem:[#allocation2 + $0x158] sm:$0xff]   ;;  %v954_v51 = vld [vmem:[#allocation2 + $0x150] sm:$0xff]   ;;  %v960_v53 = vld [vmem:[#allocation2 + $0x180] sm:$0xff]  }
  0x1e   :  { %832 = vmatpush3.bf16.msra.mxu1 %v927_v15  ;;  %v953_v50 = vld [vmem:[#allocation2 + $0x118] sm:$0xff]   ;;  %v955_v52 = vld [vmem:[#allocation2 + $0x110] sm:$0xff]   ;;  %v41_v54 = vld [vmem:[%s1119_s0 + $0x28] sm:$0xff] }
  0x1f   :  { %833 = vmatprep.subr.bf16.mxu1 %v930_v18  ;;  %v956_v55 = vld [vmem:[#allocation2 + $0x148] sm:$0xff]   ;;  %v48_v56 = vpack.c.bf16 %v41_v54, %v41_v54  ;;  %v42_v57 = vld [vmem:[%s1119_s0 + $0x30] sm:$0xff]  ;;  %v958_v60 = vld [vmem:[#allocation2 + $0x140] sm:$0xff]  }
  0x20   :  { %812 = vmatpush3.bf16.msra.mxu0 %v929_v17  ;;  %v49_v58 = vpack.c.bf16 %v42_v57, %v42_v57  ;;  %v957_v59 = vld [vmem:[#allocation2 + $0x108] sm:$0xff]   ;;  %v959_v61 = vld [vmem:[#allocation2 + $0x100] sm:$0xff]   ;;  %v961_v0 = vld [vmem:[%s1122_s3 + $0x38] sm:$0xff]  }
  0x21   :  { %813 = vmatprep.subr.bf16.mxu0 %v932_v20  ;;  %v40_v62 = vld [vmem:[%s1119_s0 + $0x20] sm:$0xff]  ;;  %v962_v1 = vld [vmem:[%s1122_s3 + $0x30] sm:$0xff]   ;;  %v963_v2 = vld [vmem:[%s1122_s3 + $0x28] sm:$0xff]  }
  0x22   :  { %834 = vmatpush3.bf16.msra.mxu1 %v931_v19  ;;  %v47_v63 = vpack.c.bf16 %v40_v62, %v40_v62  ;;  %v964_v3 = vld [vmem:[%s1122_s3 + $0x20] sm:$0xff]   ;;  %v965_v4 = vld [vmem:[%s1122_s3 + $0x18] sm:$0xff]   ;;  %v966_v5 = vld [vmem:[%s1122_s3 + $0x10] sm:$0xff]  }
  0x23   :  { %835 = vmatprep.subr.bf16.mxu1 %v934_v22  ;;  %v967_v6 = vld [vmem:[%s1122_s3 + $0x8] sm:$0xff]   ;;  %v968_v7 = vld [vmem:[%s1122_s3] sm:$0xff]  }
  0x24   :  { %814 = vmatpush3.bf16.msra.mxu0 %v933_v21  ;;  %v743_v21 = vld [vmem:[%s1121_s2] ss:$0 sm:$0xff]  ;;  %s989_s2 = scalar_lea.vmem %s735_s6, 128 }
  0x25   :  { %815 = vmatprep.subr.bf16.mxu0 %v936_v24  ;;  %v794_v34 = vld [vmem:[%s1123_s4] ss:$0 sm:$0xff]  ;;  %p990_p5 = scmp.ne.s32.totalorder %s735_s6, %s989_s2  ;;  %p995_p7 = scmp.lt.s32.totalorder %s989_s2, %s989_s2 }
  0x26   :  { %836 = vmatpush3.bf16.msra.mxu1 %v935_v23 }
  0x27   :  { %837 = vmatprep.subr.bf16.mxu1 %v938_v26  ;;  %p996_p8 = por %p995_p7, %p994_p6 }
  0x28   :  { %816 = vmatpush3.bf16.msra.mxu0 %v937_v25 }
  0x29   :  { %817 = vmatprep.subr.bf16.mxu0 %v940_v28  ;;  %p997_p9 = pnand %p996_p8, %p990_p5 }
  0x2a   :  { %838 = vmatpush3.bf16.msra.mxu1 %v939_v27 }
  0x2b   :  { %839 = vmatprep.subr.bf16.mxu1 %v942_v30 }
  0x2c   :  { %818 = vmatpush3.bf16.msra.mxu0 %v941_v29 }
  0x2d   :  { %847 = vmatprep.subr.bf16.mxu0 %v944_v36 }
  0x2e   :  { %840 = vmatpush3.bf16.msra.mxu1 %v943_v33 }
  0x2f   :  { %486 = vmatmul.mubr.bf16.vlgmr.msra.gmra.mxu0 %v43_v35  ;;  %880 = vmatprep.subr.bf16.mxu1 %v1016_v44 }
  0x30   :  { %848 = vmatpush3.bf16.msra.mxu0 %v945_v39  ;;  %565 = vmatprep.mubr.bf16.mxu0 %v48_v56 }
  0x31   :  { %526 = vmatmul.mubr.bf16.vlgmr.msra.gmra.mxu1 %v45_v41  ;;  %849 = vmatprep.subr.bf16.mxu0 %v946_v42 }
  0x32   :  { %882 = vmatprep.mubr.msk.bf16.mxu1 %vm1017_vm0, %v1016_v44  ;;  %881 = vmatpush3.bf16.msra.mxu1 %v960_v53 }
  0x33   :  { %886 = vmatprep.subr.bf16.mxu1 %v1016_v44 }
  0x34   :  { %850 = vmatpush3.bf16.msra.mxu0 %v947_v43 }
  0x35   :  { %851 = vmatprep.subr.bf16.mxu0 %v948_v45 }
  0x38   :  { %852 = vmatpush3.bf16.msra.mxu0 %v949_v46 }
  0x39   :  { %853 = vmatprep.subr.bf16.mxu0 %v950_v47  ;;  %883 = vmatmul.mubr.msk.bf16.vlgmr.msra.gmra.mxu1 %vm449_vm1, %v49_v58 }
  0x3a   :  { %902 = vmatprep.mubr.msk.bf16.mxu1 %vm1017_vm0, %v1016_v44  ;;  %887 = vmatpush3.bf16.msra.mxu1 %v961_v0 }
  0x3b   :  { %888 = vmatprep.subr.bf16.mxu1 %v1016_v44 }
  0x3c   :  { %854 = vmatpush3.bf16.msra.mxu0 %v951_v48 }
  0x3d   :  { %855 = vmatprep.subr.bf16.mxu0 %v952_v49 }
  0x3e   :  { %889 = vmatpush3.bf16.msra.mxu1 %v962_v1 }
  0x3f   :  { %890 = vmatprep.subr.bf16.mxu1 %v1016_v44 }
  0x40   :  { %856 = vmatpush3.bf16.msra.mxu0 %v953_v50 }
  0x41   :  { %857 = vmatprep.subr.bf16.mxu0 %v954_v51 }
  0x42   :  { %891 = vmatpush3.bf16.msra.mxu1 %v963_v2 }
  0x43   :  { %892 = vmatprep.subr.bf16.mxu1 %v1016_v44 }
  0x44   :  { %858 = vmatpush3.bf16.msra.mxu0 %v955_v52 }
  0x45   :  { %859 = vmatprep.subr.bf16.mxu0 %v956_v55 }
  0x46   :  { %893 = vmatpush3.bf16.msra.mxu1 %v964_v3 }
  0x47   :  { %894 = vmatprep.subr.bf16.mxu1 %v1016_v44 }
  0x48   :  { %860 = vmatpush3.bf16.msra.mxu0 %v957_v59 }
  0x49   :  { %861 = vmatprep.subr.bf16.mxu0 %v958_v60 }
  0x4a   :  { %895 = vmatpush3.bf16.msra.mxu1 %v965_v4 }
  0x4b   :  { %896 = vmatprep.subr.bf16.mxu1 %v1016_v44 }
  0x4c   :  { %862 = vmatpush3.bf16.msra.mxu0 %v959_v61 }
  0x4e   :  { %897 = vmatpush3.bf16.msra.mxu1 %v966_v5 }
  0x4f   :  { %566 = vmatmul.mubr.bf16.vlgmr.msra.gmra.mxu0 %v47_v63  ;;  %898 = vmatprep.subr.bf16.mxu1 %v1016_v44 }
  0x52   :  { %899 = vmatpush3.bf16.msra.mxu1 %v967_v6 }
  0x53   :  { %900 = vmatprep.subr.bf16.mxu1 %v1016_v44 }
  0x56   :  { %901 = vmatpush3.bf16.msra.mxu1 %v968_v7 }
  0xef   :  { %v819_v8 = vpop.f32.mrf.mxu0 }
  0xf1   :  { %v820_v9 = vpop.f32.mrf.mxu0  ;;  %v841_v10 = vpop.f32.mrf.mxu1 }
  0xf2   :  { %v821_v20 = vadd.f32 %v820_v9, %v819_v8 }
  0xf3   :  { %v822_v11 = vpop.f32.mrf.mxu0  ;;  %v842_v12 = vpop.f32.mrf.mxu1 }
  0xf4   :  { %v488_v22 = vadd.f32 %v821_v20, %v743_v21  ;;  %v843_v23 = vadd.f32 %v842_v12, %v841_v10 }
  0xf5   :  { %v823_v13 = vpop.f32.mrf.mxu0  ;;  %v844_v14 = vpop.f32.mrf.mxu1 }
  0xf6   :  { %v528_v26 = vadd.f32 %v843_v23, %v488_v22 }
  0xf7   :  { %v845_v15 = vpop.f32.mrf.mxu1 }
  0xf9   :  { %v607_v16 = vpop.f32.mrf.mxu1 }
  0xfb   :  { %v884_v17 = vpop.f32.mrf.mxu1 }
  0xfd   :  { %v610_v18 = vpop.f32.mrf.mxu1 }
  0xff   :  { %v885_v19 = vpop.f32.mrf.mxu1 }
 0x10f   :  { %v863_v24 = vpop.f32.mrf.mxu0 }
 0x111   :  { %v864_v25 = vpop.f32.mrf.mxu0 }
 0x112   :  { %v865_v27 = vadd.f32 %v864_v25, %v863_v24 }
 0x113   :  { %v866_v28 = vpop.f32.mrf.mxu0 }
 0x114   :  { %v568_v29 = vadd.f32 %v865_v27, %v528_v26 }
 0x115   :  { %v867_v30 = vpop.f32.mrf.mxu0 }
 0x116   :  { %v608_v31 = vadd.f32 %v607_v16, %v568_v29 }
 0x118   :  { %v613_v32 = vmax.f32 %v608_v31, 0.0 }
 0x11a   :  { %v614_v33 = vpack.c.bf16 %v613_v32, %v613_v32 }
 0x11c   :  { %903 = vmatmul.mubr.bf16.vlgmr.msra.gmra.mxu1 %v614_v33 }
 0x1dc   :  { %v720_v35 = vpop.f32.mrf.mxu1 }
 0x1dd   :  { %v721_v36 = vadd.f32 %v794_v34, %v720_v35 }
 0x1de   :  { %v904_v37 = vpop.f32.mrf.mxu1 }
 0x1df   :  { %727 = vst.msk [vmem:[#allocation5] sm:$0xff] %vm726_vm2, %v721_v36 }
 0x1e0   :  { %v723_v38 = vpop.f32.mrf.mxu1 }
 0x1e1   :  { %1000 = shalt.err (!%p997_p9)
}
 0x1e2   :  { %737 = dma.vmem_to_hbm [thread:$0]  %s735_s6, 128, %s1124_s5, [#allocation4]   ;;  %v905_v39 = vpop.f32.mrf.mxu1 }
 0x1e3   :  { %1011 = dma.done.wait [#allocation4], 128  }
 0x1e4   :  { %1012 = vsyncadd [#allocation4], 4294967168 }
 0x1e5   :  { %741 = vsyncpa [#allocation3], 1 }
 0x1e6   :  { %742 = vsyncpa [#allocation4], 1 }

</bundles_post_ra>
